<compile_context>
chip_gen: v7x
topology: tpu7x:2x2x1
jax: 0.10.0
libtpu: 0.0.40
codegen_flags: <defaults>
</compile_context>

<pallas_src>
import jax
import jax.numpy as jnp
from jax.experimental import pallas as pl
from jax.experimental.pallas import tpu as pltpu

CNN_FEAT = 1280      # tf_efficientnet_lite0 num_features
NUM_CLASSES = 30
OUT_PAD = 128        # lane-dense padded classifier width (30 -> 128)


def effnet_head_kernel(x_ref, w_ref, b_ref, out_ref):
    # x_ref : (bt, HW, C)   backbone feature-map tile, native dtype (f32 here)
    # w_ref : (C, OUT_PAD)  f32 classifier weight with 1/HW folded in
    # b_ref : (1, OUT_PAD)  f32 classifier bias (zero-padded to 128 lanes)
    # AdaptiveAvgPool2d(1) + flatten: spatial sum (1/HW folded into w), fused f32
    # accumulation -> no whole-tile f32 temporary.
    pooled = jnp.sum(x_ref[...], axis=1, dtype=jnp.float32)          # (bt, C) f32
    # Dropout: inference mode -> identity.
    out_ref[...] = (
        jnp.dot(pooled, w_ref[...], preferred_element_type=jnp.float32)
        + b_ref[...]
    )


def _round_up(x, m):
    return (x + m - 1) // m * m


def pack_head_params(wc, bc, hw):
    """Build the padded / 1-HW-folded classifier params ONCE (checkpoint-load time).

    wc : (CNN_FEAT, NUM_CLASSES) classifier weight (PyTorch classifier.weight.T)
    bc : (NUM_CLASSES,)          classifier bias
    hw : spatial size H*W of the backbone feature map
    """
    w_pad = jnp.zeros((CNN_FEAT, OUT_PAD), jnp.float32)
    w_pad = w_pad.at[:, :NUM_CLASSES].set(wc.astype(jnp.float32) / hw)
    b_pad = jnp.zeros((1, OUT_PAD), jnp.float32).at[0, :NUM_CLASSES].set(
        bc.astype(jnp.float32))
    return w_pad, b_pad


def efficientnet_lite0_head(feat, w_pad, b_pad):
    """Classifier head of EfficientNetLite0 (feature_only=False path).

    feat  : (N, H, W, C) channels-last backbone feature map (native dtype)
    w_pad : (CNN_FEAT, OUT_PAD) packed classifier weight (see pack_head_params)
    b_pad : (1, OUT_PAD)        packed classifier bias
    returns (N, NUM_CLASSES) f32 logits
    """
    n, h, w, c = feat.shape
    assert c == CNN_FEAT, c
    hw = h * w

    # Free reshape (merges contiguous dims), no dtype cast, no padding pass.
    x = feat.reshape(n, hw, c)

    # Batch tiling:
    #  - weights/bias stay VMEM-resident across tiles (index_map -> (0,0))
    #  - bt <= 64 keeps the double-buffered f32 input block ~37 MiB (fits v7x VMEM)
    #  - for n > 8, bt is chosen so the grid has >= 2 steps (both v7x TensorCores busy)
    if n <= 8:
        bt = n                                   # block dim == full dim is allowed
    else:
        bt = min(64, _round_up(pl.cdiv(n, 2), 8))
    grid = (pl.cdiv(n, bt),)

    bytes_accessed = (x.size * x.dtype.itemsize + w_pad.size * 4
                      + b_pad.size * 4 + n * OUT_PAD * 4)
    flops = 2 * n * CNN_FEAT * OUT_PAD + n * hw * CNN_FEAT

    out = pl.pallas_call(
        effnet_head_kernel,
        out_shape=jax.ShapeDtypeStruct((n, OUT_PAD), jnp.float32),
        grid=grid,
        in_specs=[
            pl.BlockSpec((bt, hw, CNN_FEAT), lambda i: (i, 0, 0)),
            pl.BlockSpec((CNN_FEAT, OUT_PAD), lambda i: (0, 0)),
            pl.BlockSpec((1, OUT_PAD), lambda i: (0, 0)),
        ],
        out_specs=pl.BlockSpec((bt, OUT_PAD), lambda i: (i, 0)),
        compiler_params=pltpu.CompilerParams(
            dimension_semantics=("parallel",),
            vmem_limit_bytes=48 * 1024 * 1024,   # < v7x 64 MiB physical VMEM
        ),
        cost_estimate=pl.CostEstimate(
            flops=flops, transcendentals=0, bytes_accessed=bytes_accessed),
    )(x, w_pad, b_pad)

    return out[:, :NUM_CLASSES]


if __name__ == "__main__":
    key = jax.random.PRNGKey(0)
    k1, k2, k3 = jax.random.split(key, 3)

    batch = 2
    h = w = 7   # EfficientNet-Lite0 feature map for a 224x224 input is 7x7

    # Backbone feature output (stand-in for the timm forward pass), channels-last.
    feat = jax.random.normal(k1, (batch, h, w, CNN_FEAT), dtype=jnp.float32)

    # Deterministic classifier parameters.
    wc = jax.random.normal(k2, (CNN_FEAT, NUM_CLASSES), dtype=jnp.float32) * 0.02
    bc = jax.random.normal(k3, (NUM_CLASSES,), dtype=jnp.float32) * 0.02

    # Packed params built once (checkpoint-load time), not per forward call.
    w_pad, b_pad = pack_head_params(wc, bc, h * w)

    out = efficientnet_lite0_head(feat, w_pad, b_pad)
    out = jax.block_until_ready(out)

    # Pure-JAX f32 reference of the same head (pool -> flatten -> dropout(id) -> linear).
    pooled_ref = jnp.mean(feat.reshape(batch, h * w, CNN_FEAT), axis=1)
    ref = pooled_ref @ wc + bc

    assert out.shape == (batch, NUM_CLASSES), out.shape
    assert jnp.allclose(out, ref, atol=1e-3, rtol=1e-3), "mismatch vs reference"

    print("KERNEL_OK")
</pallas_src>

<mosaic_0001>
module attributes {stable_mosaic.version = 11 : i64} {
  func.func @effnet_head_kernel(%arg0: i32, %arg1: memref<2x49x1280xf32, #tpu.memory_space<vmem>>, %arg2: memref<1280x128xf32, #tpu.memory_space<vmem>>, %arg3: memref<1x128xf32, #tpu.memory_space<vmem>>, %arg4: memref<2x128xf32, #tpu.memory_space<vmem>>) attributes {dimension_semantics = [#tpu.dimension_semantics<parallel>], iteration_bounds = array<i64: 1>, scalar_prefetch = 0 : i64, scratch_operands = 0 : i64, tpu.core_type = #tpu.core_type<tc>, window_params = [{transform_indices = @transform_0, window_bounds = array<i64: 2, 49, 1280>}, {pipeline_mode = #tpu.pipeline_mode<synchronous>, transform_indices = @transform_1, window_bounds = array<i64: 1280, 128>}, {pipeline_mode = #tpu.pipeline_mode<synchronous>, transform_indices = @transform_2, window_bounds = array<i64: 1, 128>}, {transform_indices = @transform_3, window_bounds = array<i64: 2, 128>}]} {
    %c0 = arith.constant 0 : index
    %c0_0 = arith.constant 0 : index
    %c0_1 = arith.constant 0 : index
    %0 = vector.load %arg1[%c0, %c0_0, %c0_1] : memref<2x49x1280xf32, #tpu.memory_space<vmem>>, vector<2x49x1280xf32>
    %cst = arith.constant dense<0.000000e+00> : vector<2x1280xf32>
    %1 = vector.multi_reduction <add>, %0, %cst [1] : vector<2x49x1280xf32> to vector<2x1280xf32>
    %c0_2 = arith.constant 0 : index
    %c0_3 = arith.constant 0 : index
    %2 = vector.load %arg2[%c0_2, %c0_3] : memref<1280x128xf32, #tpu.memory_space<vmem>>, vector<1280x128xf32>
    %cst_4 = arith.constant dense<0.000000e+00> : vector<2x128xf32>
    %3 = tpu.matmul %1, %2, %cst_4 {dimension_numbers = #tpu.dot_dimension_numbers<[1], [0], [0], [1], [0, 0, 1, 1], [], []>} : vector<2x1280xf32>, vector<1280x128xf32>, vector<2x128xf32> -> vector<2x128xf32>
    %c0_5 = arith.constant 0 : index
    %c0_6 = arith.constant 0 : index
    %4 = vector.load %arg3[%c0_5, %c0_6] : memref<1x128xf32, #tpu.memory_space<vmem>>, vector<1x128xf32>
    %5 = vector.broadcast %4 : vector<1x128xf32> to vector<2x128xf32>
    %6 = arith.addf %3, %5 : vector<2x128xf32>
    %c0_7 = arith.constant 0 : index
    %c0_8 = arith.constant 0 : index
    %7 = vector.load %arg4[%c0_7, %c0_8] : memref<2x128xf32, #tpu.memory_space<vmem>>, vector<2x128xf32>
    tpu.vector_store %arg4[%c0_7, %c0_8], %6 {strides = array<i32>} : memref<2x128xf32, #tpu.memory_space<vmem>>, vector<2x128xf32>,
    return
  }
  func.func @transform_0(%arg0: i32) -> (i32, i32, i32) {
    %c0_i32 = arith.constant 0 : i32
    %c0_i32_0 = arith.constant 0 : i32
    %c0_i32_1 = arith.constant 0 : i32
    return %arg0, %c0_i32, %c0_i32_0 : i32, i32, i32
  }
  func.func @transform_1(%arg0: i32) -> (i32, i32) {
    %c0_i32 = arith.constant 0 : i32
    %c0_i32_0 = arith.constant 0 : i32
    %c0_i32_1 = arith.constant 0 : i32
    return %c0_i32, %c0_i32_0 : i32, i32
  }
  func.func @transform_2(%arg0: i32) -> (i32, i32) {
    %c0_i32 = arith.constant 0 : i32
    %c0_i32_0 = arith.constant 0 : i32
    %c0_i32_1 = arith.constant 0 : i32
    return %c0_i32, %c0_i32_0 : i32, i32
  }
  func.func @transform_3(%arg0: i32) -> (i32, i32) {
    %c0_i32 = arith.constant 0 : i32
    %c0_i32_0 = arith.constant 0 : i32
    return %arg0, %c0_i32 : i32, i32
  }
}

</mosaic_0001>

<bundles_post_ra>
// kernel: tpu_custom_call.1
= control target key start
LH: loop header
LB: loop body
LE: loop exit
PB: predicated region body
PF: predicated region fallthrough
CT: control target
= control target key end

     0   :  { %vm160_vm0 = vcmask 1040384   ;;  %vm603_vm1 = vcmask 1041409   ;;  %s2514_s0 = inlined_call_operand.vmem [shape: f32[2,49,1280], index: 0, kind: input, shape index: {}]   ;;  %s2515_s1 = inlined_call_operand.vmem [shape: f32[1280,128], index: 1, kind: input, shape index: {}]   ;;  %s2516_s2 = inlined_call_operand.vmem [shape: f32[1,128], index: 2, kind: input, shape index: {}]   ;;  %s2517_s3 = inlined_call_operand.hbm [shape: f32[2,128], index: 3, kind: output, shape index: {}]  }
   0x1   :  { %v432_v0 = vld [vmem:[%s2515_s1 + $0x80] sm:$0xff]  ;;  %v433_v1 = vld [vmem:[%s2515_s1 + $0x88] sm:$0xff]  ;;  %v434_v11 = vld [vmem:[%s2515_s1 + $0x90] sm:$0xff] }
   0x2   :  { %v416_v2 = vld [vmem:[%s2515_s1] sm:$0xff]  ;;  %v1165_v3 = vpack.c.bf16 %v433_v1, %v432_v0  ;;  %v417_v4 = vld [vmem:[%s2515_s1 + $0x8] sm:$0xff]  ;;  %v435_v13 = vld [vmem:[%s2515_s1 + $0x98] sm:$0xff] }
   0x3   :  { %v464_v5 = vld [vmem:[%s2515_s1 + $0x180] sm:$0xff]  ;;  %v465_v6 = vld [vmem:[%s2515_s1 + $0x188] sm:$0xff]  ;;  %v1167_v7 = vpack.c.bf16 %v417_v4, %v416_v2  ;;  %v418_v14 = vld [vmem:[%s2515_s1 + $0x10] sm:$0xff]  ;;  %v1169_v16 = vpack.c.bf16 %v435_v13, %v434_v11 }
   0x4   :  { %v1197_v8 = vpack.c.bf16 %v465_v6, %v464_v5  ;;  %v448_v9 = vld [vmem:[%s2515_s1 + $0x100] sm:$0xff]  ;;  %v449_v10 = vld [vmem:[%s2515_s1 + $0x108] sm:$0xff]  ;;  %1166 = vmatprep.subr.bf16.mxu0 %v1165_v3  ;;  %v419_v15 = vld [vmem:[%s2515_s1 + $0x18] sm:$0xff] }
   0x5   :  { %v1199_v12 = vpack.c.bf16 %v449_v10, %v448_v9  ;;  %1168 = vmatpush3.bf16.msra.mxu0 %v1167_v7  ;;  %v1171_v17 = vpack.c.bf16 %v419_v15, %v418_v14  ;;  %v466_v18 = vld [vmem:[%s2515_s1 + $0x190] sm:$0xff]  ;;  %v467_v19 = vld [vmem:[%s2515_s1 + $0x198] sm:$0xff]  ;;  %v436_v23 = vld [vmem:[%s2515_s1 + $0xa0] sm:$0xff] }
   0x6   :  { %1198 = vmatprep.subr.bf16.mxu1 %v1197_v8  ;;  %v450_v20 = vld [vmem:[%s2515_s1 + $0x110] sm:$0xff]  ;;  %v1201_v21 = vpack.c.bf16 %v467_v19, %v466_v18  ;;  %v451_v22 = vld [vmem:[%s2515_s1 + $0x118] sm:$0xff]  ;;  %v437_v24 = vld [vmem:[%s2515_s1 + $0xa8] sm:$0xff]  ;;  %1170 = vmatprep.subr.bf16.mxu0 %v1169_v16 }
   0x7   :  { %1200 = vmatpush3.bf16.msra.mxu1 %v1199_v12  ;;  %v1203_v25 = vpack.c.bf16 %v451_v22, %v450_v20  ;;  %v1173_v26 = vpack.c.bf16 %v437_v24, %v436_v23  ;;  %v420_v27 = vld [vmem:[%s2515_s1 + $0x20] sm:$0xff]  ;;  %v421_v28 = vld [vmem:[%s2515_s1 + $0x28] sm:$0xff]  ;;  %v438_v35 = vld [vmem:[%s2515_s1 + $0xb0] sm:$0xff] }
   0x8   :  { %v468_v29 = vld [vmem:[%s2515_s1 + $0x1a0] sm:$0xff]  ;;  %1202 = vmatprep.subr.bf16.mxu1 %v1201_v21  ;;  %v469_v30 = vld [vmem:[%s2515_s1 + $0x1a8] sm:$0xff]  ;;  %v1175_v33 = vpack.c.bf16 %v421_v28, %v420_v27  ;;  %v439_v36 = vld [vmem:[%s2515_s1 + $0xb8] sm:$0xff] }
   0x9   :  { %v452_v31 = vld [vmem:[%s2515_s1 + $0x120] sm:$0xff]  ;;  %v453_v32 = vld [vmem:[%s2515_s1 + $0x128] sm:$0xff]  ;;  %1172 = vmatpush3.bf16.msra.mxu0 %v1171_v17  ;;  %v1205_v34 = vpack.c.bf16 %v469_v30, %v468_v29  ;;  %v422_v37 = vld [vmem:[%s2515_s1 + $0x30] sm:$0xff]  ;;  %v1177_v39 = vpack.c.bf16 %v439_v36, %v438_v35 }
   0xa   :  { %1174 = vmatprep.subr.bf16.mxu0 %v1173_v26  ;;  %v1207_v38 = vpack.c.bf16 %v453_v32, %v452_v31  ;;  %v423_v40 = vld [vmem:[%s2515_s1 + $0x38] sm:$0xff]  ;;  %v470_v41 = vld [vmem:[%s2515_s1 + $0x1b0] sm:$0xff]  ;;  %v440_v46 = vld [vmem:[%s2515_s1 + $0xc0] sm:$0xff] }
   0xb   :  { %1204 = vmatpush3.bf16.msra.mxu1 %v1203_v25  ;;  %v471_v42 = vld [vmem:[%s2515_s1 + $0x1b8] sm:$0xff]  ;;  %v454_v44 = vld [vmem:[%s2515_s1 + $0x130] sm:$0xff]  ;;  %v441_v47 = vld [vmem:[%s2515_s1 + $0xc8] sm:$0xff]  ;;  %v1179_v48 = vpack.c.bf16 %v423_v40, %v422_v37 }
   0xc   :  { %1206 = vmatprep.subr.bf16.mxu1 %v1205_v34  ;;  %v1209_v43 = vpack.c.bf16 %v471_v42, %v470_v41  ;;  %v455_v45 = vld [vmem:[%s2515_s1 + $0x138] sm:$0xff]  ;;  %v472_v49 = vld [vmem:[%s2515_s1 + $0x1c0] sm:$0xff]  ;;  %v473_v50 = vld [vmem:[%s2515_s1 + $0x1c8] sm:$0xff]  ;;  %v1181_v52 = vpack.c.bf16 %v441_v47, %v440_v46 }
   0xd   :  { %1176 = vmatpush3.bf16.msra.mxu0 %v1175_v33  ;;  %v1211_v51 = vpack.c.bf16 %v455_v45, %v454_v44  ;;  %v424_v53 = vld [vmem:[%s2515_s1 + $0x40] sm:$0xff]  ;;  %v425_v54 = vld [vmem:[%s2515_s1 + $0x48] sm:$0xff]  ;;  %v1213_v56 = vpack.c.bf16 %v473_v50, %v472_v49  ;;  %v442_v58 = vld [vmem:[%s2515_s1 + $0xd0] sm:$0xff] }
   0xe   :  { %1178 = vmatprep.subr.bf16.mxu0 %v1177_v39  ;;  %v456_v55 = vld [vmem:[%s2515_s1 + $0x140] sm:$0xff]  ;;  %v457_v57 = vld [vmem:[%s2515_s1 + $0x148] sm:$0xff]  ;;  %v443_v59 = vld [vmem:[%s2515_s1 + $0xd8] sm:$0xff]  ;;  %v1183_v62 = vpack.c.bf16 %v425_v54, %v424_v53 }
   0xf   :  { %1208 = vmatpush3.bf16.msra.mxu1 %v1207_v38  ;;  %v474_v60 = vld [vmem:[%s2515_s1 + $0x1d0] sm:$0xff]  ;;  %v475_v61 = vld [vmem:[%s2515_s1 + $0x1d8] sm:$0xff]  ;;  %v1215_v63 = vpack.c.bf16 %v457_v57, %v456_v55  ;;  %v1185_v0 = vpack.c.bf16 %v443_v59, %v442_v58  ;;  %v444_v6 = vld [vmem:[%s2515_s1 + $0xe0] sm:$0xff] }
  0x10   :  { %1210 = vmatprep.subr.bf16.mxu1 %v1209_v43  ;;  %v426_v1 = vld [vmem:[%s2515_s1 + $0x50] sm:$0xff]  ;;  %v427_v2 = vld [vmem:[%s2515_s1 + $0x58] sm:$0xff]  ;;  %v1217_v4 = vpack.c.bf16 %v475_v61, %v474_v60  ;;  %v445_v7 = vld [vmem:[%s2515_s1 + $0xe8] sm:$0xff] }
  0x11   :  { %1180 = vmatpush3.bf16.msra.mxu0 %v1179_v48  ;;  %v458_v3 = vld [vmem:[%s2515_s1 + $0x150] sm:$0xff]  ;;  %v459_v5 = vld [vmem:[%s2515_s1 + $0x158] sm:$0xff]  ;;  %v428_v8 = vld [vmem:[%s2515_s1 + $0x60] sm:$0xff]  ;;  %v1187_v12 = vpack.c.bf16 %v427_v2, %v426_v1  ;;  %v1189_v18 = vpack.c.bf16 %v445_v7, %v444_v6 }
  0x12   :  { %1182 = vmatprep.subr.bf16.mxu0 %v1181_v52  ;;  %v429_v9 = vld [vmem:[%s2515_s1 + $0x68] sm:$0xff]  ;;  %v476_v10 = vld [vmem:[%s2515_s1 + $0x1e0] sm:$0xff]  ;;  %v446_v15 = vld [vmem:[%s2515_s1 + $0xf0] sm:$0xff]  ;;  %v1219_v17 = vpack.c.bf16 %v459_v5, %v458_v3 }
  0x13   :  { %1212 = vmatpush3.bf16.msra.mxu1 %v1211_v51  ;;  %v477_v11 = vld [vmem:[%s2515_s1 + $0x1e8] sm:$0xff]  ;;  %v460_v13 = vld [vmem:[%s2515_s1 + $0x160] sm:$0xff]  ;;  %v447_v19 = vld [vmem:[%s2515_s1 + $0xf8] sm:$0xff]  ;;  %v1191_v31 = vpack.c.bf16 %v429_v9, %v428_v8 }
  0x14   :  { %1214 = vmatprep.subr.bf16.mxu1 %v1213_v56  ;;  %v461_v14 = vld [vmem:[%s2515_s1 + $0x168] sm:$0xff]  ;;  %v26_v20 = vld [vmem:[%s2514_s0 + $0x58] sm:$0xff]  ;;  %v1221_v22 = vpack.c.bf16 %v477_v11, %v476_v10  ;;  %v478_v23 = vld [vmem:[%s2515_s1 + $0x1f0] sm:$0xff]  ;;  %v1193_v38 = vpack.c.bf16 %v447_v19, %v446_v15 }
  0x15   :  { %1184 = vmatpush3.bf16.msra.mxu0 %v1183_v62  ;;  %v16_v16 = vld [vmem:[%s2514_s0 + $0x8] sm:$0xff]  ;;  %v479_v24 = vld [vmem:[%s2515_s1 + $0x1f8] sm:$0xff]  ;;  %v430_v27 = vld [vmem:[%s2515_s1 + $0x70] sm:$0xff]  ;;  %v1223_v37 = vpack.c.bf16 %v461_v14, %v460_v13 }
  0x16   :  { %1186 = vmatprep.subr.bf16.mxu0 %v1185_v0  ;;  %v36_v21 = vld [vmem:[%s2514_s0 + $0xa8] sm:$0xff]  ;;  %v46_v25 = vld [vmem:[%s2514_s0 + $0xf8] sm:$0xff]  ;;  %v169_v26 = vadd.f32 %v26_v20, %v16_v16  ;;  %v462_v40 = vld [vmem:[%s2515_s1 + $0x170] sm:$0xff]  ;;  %v1225_v42 = vpack.c.bf16 %v479_v24, %v478_v23 }
  0x17   :  { %1216 = vmatpush3.bf16.msra.mxu1 %v1215_v63  ;;  %v86_v28 = vld [vmem:[%s2514_s0 + $0x238] sm:$0xff]  ;;  %v96_v29 = vld [vmem:[%s2514_s0 + $0x288] sm:$0xff]  ;;  %v15_v45 = vld [vmem:[%s2514_s0] sm:$0xff] }
  0x18   :  { %1218 = vmatprep.subr.bf16.mxu1 %v1217_v4  ;;  %v106_v30 = vld [vmem:[%s2514_s0 + $0x2d8] sm:$0xff]  ;;  %v56_v33 = vld [vmem:[%s2514_s0 + $0x148] sm:$0xff]  ;;  %v170_v35 = vadd.f32 %v169_v26, %v36_v21  ;;  %v299_v36 = vadd.f32 %v96_v29, %v86_v28  ;;  %v25_v46 = vld [vmem:[%s2514_s0 + $0x50] sm:$0xff] }
  0x19   :  { %1188 = vmatpush3.bf16.msra.mxu0 %v1187_v12  ;;  %v431_v32 = vld [vmem:[%s2515_s1 + $0x78] sm:$0xff]  ;;  %v76_v34 = vld [vmem:[%s2514_s0 + $0x1e8] sm:$0x1]  ;;  %v35_v47 = vld [vmem:[%s2514_s0 + $0xa0] sm:$0xff]  ;;  %v155_v51 = vadd.f32 %v25_v46, %v15_v45 }
  0x1a   :  { %1190 = vmatprep.subr.bf16.mxu0 %v1189_v18  ;;  %v116_v39 = vld [vmem:[%s2514_s0 + $0x328] sm:$0xff]  ;;  %v463_v41 = vld [vmem:[%s2515_s1 + $0x178] sm:$0xff]  ;;  %v171_v43 = vadd.f32 %v170_v35, %v46_v25  ;;  %v300_v44 = vadd.f32 %v299_v36, %v106_v30  ;;  %v1195_v52 = vpack.c.bf16 %v431_v32, %v430_v27  ;;  %v45_v55 = vld [vmem:[%s2514_s0 + $0xf0] sm:$0xff]  ;;  %v174_v59 = vsel %vm160_vm0, %v76_v34, 0.0 }
  0x1b   :  { %1220 = vmatpush3.bf16.msra.mxu1 %v1219_v17  ;;  %v66_v48 = vld [vmem:[%s2514_s0 + $0x198] sm:$0xff]  ;;  %v85_v56 = vld [vmem:[%s2514_s0 + $0x230] sm:$0xff]  ;;  %v95_v57 = vld [vmem:[%s2514_s0 + $0x280] sm:$0xff]  ;;  %v1227_v60 = vpack.c.bf16 %v463_v41, %v462_v40  ;;  %v156_v63 = vadd.f32 %v155_v51, %v35_v47 }
  0x1c   :  { %1222 = vmatprep.subr.bf16.mxu1 %v1221_v22  ;;  %v126_v49 = vld [vmem:[%s2514_s0 + $0x378] sm:$0xff]  ;;  %v172_v53 = vadd.f32 %v171_v43, %v56_v33  ;;  %v301_v54 = vadd.f32 %v300_v44, %v116_v39  ;;  %v136_v58 = vld [vmem:[%s2514_s0 + $0x3c8] sm:$0xff]  ;;  %v55_v61 = vld [vmem:[%s2514_s0 + $0x140] sm:$0xff]  ;;  %v286_v0 = vadd.f32 %v95_v57, %v85_v56 }
  0x1d   :  { %v146_v50 = vld [vmem:[%s2514_s0 + $0x418] sm:$0x1]  ;;  %1192 = vmatpush3.bf16.msra.mxu0 %v1191_v31  ;;  %v105_v62 = vld [vmem:[%s2514_s0 + $0x2d0] sm:$0xff]  ;;  %v75_v4 = vld [vmem:[%s2514_s0 + $0x1e0] sm:$0x1]  ;;  %v157_v8 = vadd.f32 %v156_v63, %v45_v55 }
  0x1e   :  { %1194 = vmatprep.subr.bf16.mxu0 %v1193_v38  ;;  %v173_v1 = vadd.f32 %v172_v53, %v66_v48  ;;  %v302_v2 = vadd.f32 %v301_v54, %v126_v49  ;;  %v65_v3 = vld [vmem:[%s2514_s0 + $0x190] sm:$0xff]  ;;  %v115_v5 = vld [vmem:[%s2514_s0 + $0x320] sm:$0xff]  ;;  %v304_v7 = vsel %vm160_vm0, %v146_v50, 0.0  ;;  %v287_v9 = vadd.f32 %v286_v0, %v105_v62  ;;  %v497_v10 = vld [vmem:[%s2515_s1 + $0x288] sm:$0xff] }
  0x1f   :  { %1224 = vmatpush3.bf16.msra.mxu1 %v1223_v37  ;;  %v496_v6 = vld [vmem:[%s2515_s1 + $0x280] sm:$0xff]  ;;  %v18_v11 = vld [vmem:[%s2514_s0 + $0x18] sm:$0xff]  ;;  %v28_v12 = vld [vmem:[%s2514_s0 + $0x68] sm:$0xff]  ;;  %v158_v20 = vadd.f32 %v157_v8, %v55_v61  ;;  %v161_v28 = vsel %vm160_vm0, %v75_v4, 0.0 }
  0x20   :  { %1226 = vmatprep.subr.bf16.mxu1 %v1225_v42  ;;  %v175_v13 = vadd.f32 %v174_v59, %v173_v1  ;;  %v303_v14 = vadd.f32 %v302_v2, %v136_v58  ;;  %v125_v15 = vld [vmem:[%s2514_s0 + $0x370] sm:$0xff]  ;;  %v1229_v17 = vpack.c.bf16 %v497_v10, %v496_v6  ;;  %v38_v18 = vld [vmem:[%s2514_s0 + $0xb8] sm:$0xff]  ;;  %v195_v19 = vadd.f32 %v28_v12, %v18_v11  ;;  %v48_v22 = vld [vmem:[%s2514_s0 + $0x108] sm:$0xff] }
  0x21   :  { %1196 = vmatpush3.bf16.msra.mxu0 %v1195_v52  ;;  %v145_v16 = vld [vmem:[%s2514_s0 + $0x410] sm:$0x1]  ;;  %v288_v21 = vadd.f32 %v287_v9, %v115_v5  ;;  %v78_v23 = vld [vmem:[%s2514_s0 + $0x1f8] sm:$0x1]  ;;  %v88_v24 = vld [vmem:[%s2514_s0 + $0x248] sm:$0xff]  ;;  %v159_v32 = vadd.f32 %v158_v20, %v65_v3 }
  0x22   :  { %v176_v25 = vrot.slane %v175_v13, 4  ;;  %v305_v26 = vadd.f32 %v304_v7, %v303_v14  ;;  %v135_v27 = vld [vmem:[%s2514_s0 + $0x3c0] sm:$0xff]  ;;  %1230 = vmatprep.subr.bf16.mxu0 %v1229_v17  ;;  %v98_v29 = vld [vmem:[%s2514_s0 + $0x298] sm:$0xff]  ;;  %v108_v30 = vld [vmem:[%s2514_s0 + $0x2e8] sm:$0xff]  ;;  %v196_v31 = vadd.f32 %v195_v19, %v38_v18  ;;  %v291_v34 = vsel %vm160_vm0, %v145_v16, 0.0 }
  0x23   :  { %1228 = vmatpush3.bf16.msra.mxu1 %v1227_v60  ;;  %v289_v33 = vadd.f32 %v288_v21, %v125_v15  ;;  %v58_v35 = vld [vmem:[%s2514_s0 + $0x158] sm:$0xff]  ;;  %v148_v36 = vld [vmem:[%s2514_s0 + $0x428] sm:$0x1]  ;;  %v325_v37 = vadd.f32 %v98_v29, %v88_v24  ;;  %v200_v42 = vsel %vm160_vm0, %v78_v23, 0.0  ;;  %v17_v43 = vld [vmem:[%s2514_s0 + $0x10] sm:$0xff]  ;;  %v162_v44 = vadd.f32 %v161_v28, %v159_v32 }
  0x24   :  { %v177_v38 = vadd.f32 %v176_v25, %v175_v13  ;;  %v306_v39 = vrot.slane %v305_v26, 4  ;;  %v118_v40 = vld [vmem:[%s2514_s0 + $0x338] sm:$0xff]  ;;  %v197_v41 = vadd.f32 %v196_v31, %v48_v22  ;;  %v68_v46 = vld [vmem:[%s2514_s0 + $0x1a8] sm:$0xff]  ;;  %v330_v48 = vsel %vm160_vm0, %v148_v36, 0.0  ;;  %v27_v49 = vld [vmem:[%s2514_s0 + $0x60] sm:$0xff] }
  0x25   :  { %v290_v45 = vadd.f32 %v289_v33, %v135_v27  ;;  %v326_v47 = vadd.f32 %v325_v37, %v108_v30  ;;  %v37_v50 = vld [vmem:[%s2514_s0 + $0xb0] sm:$0xff]  ;;  %v128_v53 = vld [vmem:[%s2514_s0 + $0x388] sm:$0xff]  ;;  %v182_v56 = vadd.f32 %v27_v49, %v17_v43  ;;  %v163_v57 = vrot.slane %v162_v44, 4  ;;  %v47_v60 = vld [vmem:[%s2514_s0 + $0x100] sm:$0xff] }
  0x26   :  { %v178_v51 = vrot.slane %v177_v38, 2  ;;  %v307_v52 = vadd.f32 %v306_v39, %v305_v26  ;;  %v198_v54 = vadd.f32 %v197_v41, %v58_v35  ;;  %v77_v55 = vld [vmem:[%s2514_s0 + $0x1f0] sm:$0x1]  ;;  %v87_v61 = vld [vmem:[%s2514_s0 + $0x240] sm:$0xff]  ;;  %v138_v2 = vld [vmem:[%s2514_s0 + $0x3d8] sm:$0xff] }
  0x27   :  { %v292_v58 = vadd.f32 %v291_v34, %v290_v45  ;;  %v327_v59 = vadd.f32 %v326_v47, %v118_v40  ;;  %v97_v62 = vld [vmem:[%s2514_s0 + $0x290] sm:$0xff]  ;;  %v187_v63 = vsel %vm160_vm0, %v77_v55, 0.0  ;;  %v107_v4 = vld [vmem:[%s2514_s0 + $0x2e0] sm:$0xff]  ;;  %v183_v5 = vadd.f32 %v182_v56, %v37_v50  ;;  %v529_v32 = vld [vmem:[%s2515_s1 + $0x388] sm:$0xff] }
  0x28   :  { %v179_v0 = vadd.f32 %v178_v51, %v177_v38  ;;  %v308_v1 = vrot.slane %v307_v52, 2  ;;  %v199_v3 = vadd.f32 %v198_v54, %v68_v46  ;;  %v164_v6 = vadd.f32 %v163_v57, %v162_v44  ;;  %v57_v9 = vld [vmem:[%s2514_s0 + $0x150] sm:$0xff]  ;;  %v67_v19 = vld [vmem:[%s2514_s0 + $0x1a0] sm:$0xff]  ;;  %v481_v45 = vld [vmem:[%s2515_s1 + $0x208] sm:$0xff] }
  0x29   :  { %v293_v7 = vrot.slane %v292_v58, 4  ;;  %v328_v8 = vadd.f32 %v327_v59, %v128_v53  ;;  %v312_v10 = vadd.f32 %v97_v62, %v87_v61  ;;  %v117_v14 = vld [vmem:[%s2514_s0 + $0x330] sm:$0xff]  ;;  %v184_v15 = vadd.f32 %v183_v5, %v47_v60  ;;  %v147_v20 = vld [vmem:[%s2514_s0 + $0x420] sm:$0x1]  ;;  %v499_v53 = vld [vmem:[%s2515_s1 + $0x298] sm:$0xff] }
  0x2a   :  { %v180_v11 = vrot.slane %v179_v0, 1  ;;  %v309_v12 = vadd.f32 %v308_v1, %v307_v52  ;;  %v201_v13 = vadd.f32 %v200_v42, %v199_v3  ;;  %v165_v16 = vrot.slane %v164_v6, 2  ;;  %v127_v25 = vld [vmem:[%s2514_s0 + $0x380] sm:$0xff]  ;;  %v137_v35 = vld [vmem:[%s2514_s0 + $0x3d0] sm:$0xff]  ;;  %v501_v5 = vld [vmem:[%s2515_s1 + $0x2a8] sm:$0xff] }
  0x2b   :  { %v294_v17 = vadd.f32 %v293_v7, %v292_v58  ;;  %v329_v18 = vadd.f32 %v328_v8, %v138_v2  ;;  %v313_v21 = vadd.f32 %v312_v10, %v107_v4  ;;  %v185_v26 = vadd.f32 %v184_v15, %v57_v9  ;;  %v528_v31 = vld [vmem:[%s2515_s1 + $0x380] sm:$0xff]  ;;  %v498_v52 = vld [vmem:[%s2515_s1 + $0x290] sm:$0xff] }
  0x2c   :  { %v181_v22 = vadd.f32 %v180_v11, %v179_v0  ;;  %v310_v23 = vrot.slane %v309_v12, 1  ;;  %v202_v24 = vrot.slane %v201_v13, 4  ;;  %v166_v27 = vadd.f32 %v165_v16, %v164_v6  ;;  %v480_v44 = vld [vmem:[%s2515_s1 + $0x200] sm:$0xff]  ;;  %v483_v0 = vld [vmem:[%s2515_s1 + $0x218] sm:$0xff] }
  0x2d   :  { %v295_v28 = vrot.slane %v294_v17, 2  ;;  %v331_v29 = vadd.f32 %v330_v48, %v329_v18  ;;  %v314_v30 = vadd.f32 %v313_v21, %v117_v14  ;;  %v186_v36 = vadd.f32 %v185_v26, %v67_v19  ;;  %v500_v4 = vld [vmem:[%s2515_s1 + $0x2a0] sm:$0xff]  ;;  %v485_v14 = vld [vmem:[%s2515_s1 + $0x228] sm:$0xff]  ;;  %v1796_v19 = vld [vmem:[%s2515_s1 + $0x390] sm:$0xff] }
  0x2e   :  { %v311_v33 = vadd.f32 %v310_v23, %v309_v12  ;;  %v203_v34 = vadd.f32 %v202_v24, %v201_v13  ;;  %v317_v37 = vsel %vm160_vm0, %v147_v20, 0.0  ;;  %v167_v38 = vrot.slane %v166_v27, 1  ;;  %v484_v13 = vld [vmem:[%s2515_s1 + $0x220] sm:$0xff]  ;;  %v1791_v18 = vld [vmem:[%s2515_s1 + $0x308] sm:$0xff]  ;;  %v1801_v20 = vld [vmem:[%s2515_s1 + $0x398] sm:$0xff] }
  0x2f   :  { %v296_v39 = vadd.f32 %v295_v28, %v294_v17  ;;  %v332_v40 = vrot.slane %v331_v29, 4  ;;  %v315_v41 = vadd.f32 %v314_v30, %v127_v25  ;;  %v188_v46 = vadd.f32 %v187_v63, %v186_v36  ;;  %v482_v63 = vld [vmem:[%s2515_s1 + $0x210] sm:$0xff]  ;;  %v1786_v17 = vld [vmem:[%s2515_s1 + $0x300] sm:$0xff]  ;;  %v503_v24 = vld [vmem:[%s2515_s1 + $0x2b8] sm:$0xff] }
  0x30   :  { %v605_v42 = vsel %vm603_vm1, %v311_v33, %v181_v22  ;;  %v204_v43 = vrot.slane %v203_v34, 2  ;;  %v1261_v47 = vpack.c.bf16 %v529_v32, %v528_v31  ;;  %v168_v48 = vadd.f32 %v167_v38, %v166_v27  ;;  %v1806_v21 = vld [vmem:[%s2515_s1 + $0x310] sm:$0xff]  ;;  %v1811_v22 = vld [vmem:[%s2515_s1 + $0x318] sm:$0xff]  ;;  %v1822_v26 = vld [vmem:[%s2515_s1 + $0x3a0] sm:$0xff] }
  0x31   :  { %688 = vmatprep.mubr.f32.mxu0 %v605_v42  ;;  %v297_v49 = vrot.slane %v296_v39, 1  ;;  %v333_v50 = vadd.f32 %v332_v40, %v331_v29  ;;  %v316_v51 = vadd.f32 %v315_v41, %v137_v35  ;;  %v189_v55 = vrot.slane %v188_v46, 4  ;;  %v502_v23 = vld [vmem:[%s2515_s1 + $0x2b0] sm:$0xff]  ;;  %v1827_v27 = vld [vmem:[%s2515_s1 + $0x3a8] sm:$0xff]  ;;  %v1832_v28 = vld [vmem:[%s2515_s1 + $0x320] sm:$0xff] }
  0x32   :  { %v205_v54 = vadd.f32 %v204_v43, %v203_v34  ;;  %1262 = vmatprep.subr.bf16.mxu1 %v1261_v47  ;;  %v1231_v58 = vpack.c.bf16 %v481_v45, %v480_v44  ;;  %v1233_v62 = vpack.c.bf16 %v499_v53, %v498_v52  ;;  %v1235_v10 = vpack.c.bf16 %v483_v0, %v482_v63  ;;  %v1837_v29 = vld [vmem:[%s2515_s1 + $0x328] sm:$0xff]  ;;  %v1842_v30 = vld [vmem:[%s2515_s1 + $0x230] sm:$0xff]  ;;  %v1847_v31 = vld [vmem:[%s2515_s1 + $0x238] sm:$0xff] }
  0x33   :  { %v298_v56 = vadd.f32 %v297_v49, %v296_v39  ;;  %v334_v57 = vrot.slane %v333_v50, 2  ;;  %v318_v59 = vadd.f32 %v317_v37, %v316_v51  ;;  %v190_v61 = vadd.f32 %v189_v55, %v188_v46  ;;  %v1853_v35 = vld [vmem:[%s2515_s1 + $0x3b0] sm:$0xff]  ;;  %v1858_v36 = vld [vmem:[%s2515_s1 + $0x3b8] sm:$0xff]  ;;  %v1863_v37 = vld [vmem:[%s2515_s1 + $0x2c0] sm:$0xff] }
  0x34   :  { %v206_v60 = vrot.slane %v205_v54, 1  ;;  %v1237_v12 = vpack.c.bf16 %v501_v5, %v500_v4  ;;  %v1239_v34 = vpack.c.bf16 %v485_v14, %v484_v13  ;;  %v1868_v38 = vld [vmem:[%s2515_s1 + $0x2c8] sm:$0xff]  ;;  %v1241_v39 = vpack.c.bf16 %v503_v24, %v502_v23  ;;  %v1873_v40 = vld [vmem:[%s2515_s1 + $0x330] sm:$0xff]  ;;  %v1878_v41 = vld [vmem:[%s2515_s1 + $0x338] sm:$0xff] }
  0x35   :  { %v604_v1 = vsel %vm603_vm1, %v298_v56, %v168_v48  ;;  %v335_v2 = vadd.f32 %v334_v57, %v333_v50  ;;  %v319_v3 = vrot.slane %v318_v59, 4  ;;  %v191_v6 = vrot.slane %v190_v61, 2  ;;  %v1883_v42 = vld [vmem:[%s2515_s1 + $0x240] sm:$0xff]  ;;  %v1888_v43 = vld [vmem:[%s2515_s1 + $0x248] sm:$0xff]  ;;  %v1916_v51 = vld [vmem:[%s2515_s1 + $0x2d0] sm:$0xff] }
  0x36   :  { %689 = vmatmul.mubr.f32.vlgmr.msra.gmra.mrb[0].mxu0 %v604_v1  ;;  %v207_v7 = vadd.f32 %v206_v60, %v205_v54  ;;  %v1893_v44 = vld [vmem:[%s2515_s1 + $0x3c0] sm:$0xff]  ;;  %v1898_v45 = vld [vmem:[%s2515_s1 + $0x3c8] sm:$0xff]  ;;  %v1921_v52 = vld [vmem:[%s2515_s1 + $0x2d8] sm:$0xff]  ;;  %v1263_v55 = vpack.c.bf16 %v1791_v18, %v1786_v17  ;;  %v1265_v56 = vpack.c.bf16 %v1801_v20, %v1796_v19  ;;  %v1267_v57 = vpack.c.bf16 %v1811_v22, %v1806_v21 }
  0x37   :  { %v336_v8 = vrot.slane %v335_v2, 1  ;;  %1232 = vmatpush3.bf16.msra.mxu0 %v1231_v58  ;;  %v320_v9 = vadd.f32 %v319_v3, %v318_v59  ;;  %v192_v11 = vadd.f32 %v191_v6, %v190_v61  ;;  %v20_v46 = vld [vmem:[%s2514_s0 + $0x28] sm:$0xff]  ;;  %v1906_v49 = vld [vmem:[%s2515_s1 + $0x340] sm:$0xff]  ;;  %v30_v53 = vld [vmem:[%s2514_s0 + $0x78] sm:$0xff]  ;;  %v1269_v1 = vpack.c.bf16 %v1827_v27, %v1822_v26 }
  0x38   :  { %1234 = vmatprep.subr.bf16.mxu0 %v1233_v62  ;;  %v1911_v50 = vld [vmem:[%s2515_s1 + $0x348] sm:$0xff]  ;;  %v1938_v58 = vld [vmem:[%s2515_s1 + $0x250] sm:$0xff]  ;;  %v1943_v59 = vld [vmem:[%s2515_s1 + $0x258] sm:$0xff]  ;;  %v221_v63 = vadd.f32 %v30_v53, %v20_v46  ;;  %v1243_v3 = vpack.c.bf16 %v1847_v31, %v1842_v30  ;;  %v1247_v17 = vpack.c.bf16 %v1888_v43, %v1883_v42  ;;  %v1277_v18 = vpack.c.bf16 %v1898_v45, %v1893_v44 }
  0x39   :  { %v337_v15 = vadd.f32 %v336_v8, %v335_v2  ;;  %v321_v16 = vrot.slane %v320_v9, 2  ;;  %v193_v25 = vrot.slane %v192_v11, 1  ;;  %v40_v54 = vld [vmem:[%s2514_s0 + $0xc8] sm:$0xff]  ;;  %v1948_v60 = vld [vmem:[%s2515_s1 + $0x3d0] sm:$0xff]  ;;  %v1953_v61 = vld [vmem:[%s2515_s1 + $0x3d8] sm:$0xff]  ;;  %v1271_v2 = vpack.c.bf16 %v1837_v29, %v1832_v28 }
  0x3a   :  { %v50_v62 = vld [vmem:[%s2514_s0 + $0x118] sm:$0xff]  ;;  %v1967_v4 = vld [vmem:[%s2515_s1 + $0x350] sm:$0xff]  ;;  %v100_v6 = vld [vmem:[%s2514_s0 + $0x2a8] sm:$0xff]  ;;  %v1273_v8 = vpack.c.bf16 %v1858_v36, %v1853_v35  ;;  %v222_v13 = vadd.f32 %v221_v63, %v40_v54 }
  0x3b   :  { %v607_v32 = vsel %vm603_vm1, %v337_v15, %v207_v7  ;;  %v322_v33 = vadd.f32 %v321_v16, %v320_v9  ;;  %1236 = vmatpush3.bf16.msra.mxu0 %v1235_v10  ;;  %v194_v47 = vadd.f32 %v193_v25, %v192_v11  ;;  %v90_v5 = vld [vmem:[%s2514_s0 + $0x258] sm:$0xff]  ;;  %v1245_v9 = vpack.c.bf16 %v1868_v38, %v1863_v37  ;;  %v1990_v11 = vld [vmem:[%s2515_s1 + $0x2e0] sm:$0xff]  ;;  %v2012_v20 = vld [vmem:[%s2515_s1 + $0x268] sm:$0xff] }
  0x3c   :  { %758 = vmatprep.mubr.f32.mxu1 %v607_v32  ;;  %1238 = vmatprep.subr.bf16.mxu0 %v1237_v12  ;;  %v110_v7 = vld [vmem:[%s2514_s0 + $0x2f8] sm:$0xff]  ;;  %v1995_v12 = vld [vmem:[%s2515_s1 + $0x2e8] sm:$0xff]  ;;  %v351_v14 = vadd.f32 %v100_v6, %v90_v5  ;;  %v1275_v16 = vpack.c.bf16 %v1878_v41, %v1873_v40  ;;  %v2007_v19 = vld [vmem:[%s2515_s1 + $0x260] sm:$0xff]  ;;  %v1279_v32 = vpack.c.bf16 %v1911_v50, %v1906_v49 }
  0x3d   :  { %v323_v48 = vrot.slane %v322_v33, 1  ;;  %v1985_v10 = vld [vmem:[%s2515_s1 + $0x358] sm:$0xff]  ;;  %v2017_v23 = vld [vmem:[%s2515_s1 + $0x3e0] sm:$0xff]  ;;  %v2022_v24 = vld [vmem:[%s2515_s1 + $0x3e8] sm:$0xff]  ;;  %v223_v38 = vadd.f32 %v222_v13, %v50_v62  ;;  %v1253_v13 = vpack.c.bf16 %v1995_v12, %v1990_v11 }
  0x3e   :  { %v60_v25 = vld [vmem:[%s2514_s0 + $0x168] sm:$0xff]  ;;  %v19_v42 = vld [vmem:[%s2514_s0 + $0x20] sm:$0xff]  ;;  %v29_v43 = vld [vmem:[%s2514_s0 + $0x70] sm:$0xff]  ;;  %v1285_v11 = vpack.c.bf16 %v2022_v24, %v2017_v23 }
  0x3f   :  { %v324_v0 = vadd.f32 %v323_v48, %v322_v33  ;;  %1240 = vmatpush3.bf16.msra.mxu0 %v1239_v34  ;;  %v80_v30 = vld [vmem:[%s2514_s0 + $0x208] sm:$0x1]  ;;  %v1249_v33 = vpack.c.bf16 %v1921_v52, %v1916_v51  ;;  %v2040_v34 = vld [vmem:[%s2515_s1 + $0x360] sm:$0xff]  ;;  %v1281_v48 = vpack.c.bf16 %v1953_v61, %v1948_v60  ;;  %v2063_v51 = vld [vmem:[%s2515_s1 + $0x2f0] sm:$0xff]  ;;  %v208_v62 = vadd.f32 %v29_v43, %v19_v42 }
  0x40   :  { %1242 = vmatprep.subr.bf16.mxu0 %v1241_v39  ;;  %v120_v31 = vld [vmem:[%s2514_s0 + $0x348] sm:$0xff]  ;;  %v352_v39 = vadd.f32 %v351_v14, %v110_v7  ;;  %v39_v46 = vld [vmem:[%s2514_s0 + $0xc0] sm:$0xff]  ;;  %v2068_v52 = vld [vmem:[%s2515_s1 + $0x2f8] sm:$0xff]  ;;  %v224_v5 = vadd.f32 %v223_v38, %v60_v25  ;;  %v1255_v42 = vpack.c.bf16 %v2012_v20, %v2007_v19 }
  0x41   :  { %v606_v15 = vsel %vm603_vm1, %v324_v0, %v194_v47  ;;  %v2045_v37 = vld [vmem:[%s2515_s1 + $0x368] sm:$0xff]  ;;  %v1251_v47 = vpack.c.bf16 %v1943_v59, %v1938_v58  ;;  %v70_v53 = vld [vmem:[%s2514_s0 + $0x1b8] sm:$0xff]  ;;  %v2084_v0 = vld [vmem:[%s2515_s1 + $0x270] sm:$0xff]  ;;  %v209_v38 = vadd.f32 %v208_v62, %v39_v46  ;;  %v1257_v22 = vpack.c.bf16 %v2068_v52, %v2063_v51 }
  0x42   :  { %759 = vmatmul.mubr.f32.vlgmr.msra.gmra.mrb[0].mxu1 %v606_v15  ;;  %v130_v54 = vld [vmem:[%s2514_s0 + $0x398] sm:$0xff]  ;;  %v353_v6 = vadd.f32 %v352_v39, %v120_v31  ;;  %v89_v7 = vld [vmem:[%s2514_s0 + $0x250] sm:$0xff]  ;;  %v140_v14 = vld [vmem:[%s2514_s0 + $0x3e8] sm:$0xff]  ;;  %v226_v15 = vsel %vm160_vm0, %v80_v30, 0.0  ;;  %v225_v12 = vadd.f32 %v224_v5, %v70_v53  ;;  %v1287_v53 = vpack.c.bf16 %v2045_v37, %v2040_v34 }
  0x43   :  { %1264 = vmatpush3.bf16.msra.mxu1 %v1263_v55  ;;  %1244 = vmatpush3.bf16.msra.mxu0 %v1243_v3  ;;  %v150_v55 = vld [vmem:[%s2514_s0 + $0x438] sm:$0x1]  ;;  %v59_v25 = vld [vmem:[%s2514_s0 + $0x160] sm:$0xff]  ;;  %v109_v31 = vld [vmem:[%s2514_s0 + $0x2f0] sm:$0xff] }
  0x44   :  { %1266 = vmatprep.subr.bf16.mxu1 %v1265_v56  ;;  %1246 = vmatprep.subr.bf16.mxu0 %v1245_v9  ;;  %v2089_v3 = vld [vmem:[%s2515_s1 + $0x278] sm:$0xff]  ;;  %v49_v56 = vld [vmem:[%s2514_s0 + $0x110] sm:$0xff]  ;;  %v99_v9 = vld [vmem:[%s2514_s0 + $0x2a0] sm:$0xff]  ;;  %v354_v43 = vadd.f32 %v353_v6, %v130_v54  ;;  %v356_v54 = vsel %vm160_vm0, %v150_v55, 0.0 }
  0x45   :  { %v338_v39 = vadd.f32 %v99_v9, %v89_v7  ;;  %v69_v30 = vld [vmem:[%s2514_s0 + $0x1b0] sm:$0xff]  ;;  %v79_v63 = vld [vmem:[%s2514_s0 + $0x200] sm:$0x1]  ;;  %v210_v5 = vadd.f32 %v209_v38, %v49_v56  ;;  %v2139_v7 = vld [vmem:[%s2515_s1 + $0x488] sm:$0xff]  ;;  %v1259_v26 = vpack.c.bf16 %v2089_v3, %v2084_v0 }
  0x46   :  { %v119_v46 = vld [vmem:[%s2514_s0 + $0x340] sm:$0xff]  ;;  %v22_v9 = vld [vmem:[%s2514_s0 + $0x38] sm:$0xff]  ;;  %v32_v21 = vld [vmem:[%s2514_s0 + $0x88] sm:$0xff] }
  0x47   :  { %v2128_v62 = vld [vmem:[%s2515_s1 + $0x480] sm:$0xff]  ;;  %1268 = vmatpush3.bf16.msra.mxu1 %v1267_v57  ;;  %1248 = vmatpush3.bf16.msra.mxu0 %v1247_v17  ;;  %v339_v6 = vadd.f32 %v338_v39, %v109_v31  ;;  %v227_v57 = vadd.f32 %v226_v15, %v225_v12  ;;  %v355_v17 = vadd.f32 %v354_v43, %v140_v14  ;;  %v129_v55 = vld [vmem:[%s2514_s0 + $0x390] sm:$0xff]  ;;  %v42_v31 = vld [vmem:[%s2514_s0 + $0xd8] sm:$0xff]  ;;  %v213_v39 = vsel %vm160_vm0, %v79_v63, 0.0 }
  0x48   :  { %1270 = vmatprep.subr.bf16.mxu1 %v1269_v1  ;;  %1250 = vmatprep.subr.bf16.mxu0 %v1249_v33  ;;  %v149_v56 = vld [vmem:[%s2514_s0 + $0x430] sm:$0x1]  ;;  %v211_v27 = vadd.f32 %v210_v5, %v59_v25  ;;  %v82_v33 = vld [vmem:[%s2514_s0 + $0x218] sm:$0x1]  ;;  %v92_v51 = vld [vmem:[%s2514_s0 + $0x268] sm:$0xff]  ;;  %v247_v52 = vadd.f32 %v32_v21, %v22_v9  ;;  %v1293_v25 = vpack.c.bf16 %v2139_v7, %v2128_v62 }
  0x49   :  { %v340_v1 = vadd.f32 %v339_v6, %v119_v46  ;;  %v228_v14 = vrot.slane %v227_v57, 4  ;;  %v357_v15 = vadd.f32 %v356_v54, %v355_v17  ;;  %v139_v38 = vld [vmem:[%s2514_s0 + $0x3e0] sm:$0xff]  ;;  %v52_v12 = vld [vmem:[%s2514_s0 + $0x128] sm:$0xff]  ;;  %v102_v43 = vld [vmem:[%s2514_s0 + $0x2b8] sm:$0xff]  ;;  %v343_v54 = vsel %vm160_vm0, %v149_v56, 0.0 }
  0x4a   :  { %v212_v63 = vadd.f32 %v211_v27, %v69_v30  ;;  %v112_v5 = vld [vmem:[%s2514_s0 + $0x308] sm:$0xff]  ;;  %v248_v9 = vadd.f32 %v247_v52, %v42_v31  ;;  %v62_v58 = vld [vmem:[%s2514_s0 + $0x178] sm:$0xff]  ;;  %v252_v59 = vsel %vm160_vm0, %v82_v33, 0.0  ;;  %v101_v40 = vld [vmem:[%s2514_s0 + $0x2b0] sm:$0xff] }
  0x4b   :  { %1272 = vmatpush3.bf16.msra.mxu1 %v1271_v2  ;;  %1252 = vmatpush3.bf16.msra.mxu0 %v1251_v47  ;;  %v341_v46 = vadd.f32 %v340_v1, %v129_v55  ;;  %v152_v6 = vld [vmem:[%s2514_s0 + $0x448] sm:$0x1]  ;;  %v229_v28 = vadd.f32 %v228_v14, %v227_v57  ;;  %v358_v29 = vrot.slane %v357_v15, 4  ;;  %v377_v2 = vadd.f32 %v102_v43, %v92_v51  ;;  %v21_v47 = vld [vmem:[%s2514_s0 + $0x30] sm:$0xff]  ;;  %v122_v35 = vld [vmem:[%s2514_s0 + $0x358] sm:$0xff] }
  0x4c   :  { %1274 = vmatprep.subr.bf16.mxu1 %v1273_v8  ;;  %1254 = vmatprep.subr.bf16.mxu0 %v1253_v13  ;;  %v214_v30 = vadd.f32 %v213_v39, %v212_v63  ;;  %v249_v36 = vadd.f32 %v248_v9, %v52_v12  ;;  %v382_v8 = vsel %vm160_vm0, %v152_v6, 0.0  ;;  %v31_v13 = vld [vmem:[%s2514_s0 + $0x80] sm:$0xff]  ;;  %v41_v57 = vld [vmem:[%s2514_s0 + $0xd0] sm:$0xff]  ;;  %v72_v56 = vld [vmem:[%s2514_s0 + $0x1c8] sm:$0xff] }
  0x4d   :  { %v342_v21 = vadd.f32 %v341_v46, %v139_v38  ;;  %v230_v17 = vrot.slane %v229_v28, 2  ;;  %v359_v55 = vadd.f32 %v358_v29, %v357_v15  ;;  %v132_v31 = vld [vmem:[%s2514_s0 + $0x3a8] sm:$0xff]  ;;  %v378_v27 = vadd.f32 %v377_v2, %v112_v5  ;;  %v81_v1 = vld [vmem:[%s2514_s0 + $0x210] sm:$0x1]  ;;  %v51_v15 = vld [vmem:[%s2514_s0 + $0x120] sm:$0xff] }
  0x4e   :  { %v234_v33 = vadd.f32 %v31_v13, %v21_v47  ;;  %v215_v51 = vrot.slane %v214_v30, 4  ;;  %v250_v14 = vadd.f32 %v249_v36, %v62_v58  ;;  %v91_v38 = vld [vmem:[%s2514_s0 + $0x260] sm:$0xff]  ;;  %v239_v41 = vsel %vm160_vm0, %v81_v1, 0.0  ;;  %v142_v63 = vld [vmem:[%s2514_s0 + $0x3f8] sm:$0xff]  ;;  %v61_v44 = vld [vmem:[%s2514_s0 + $0x170] sm:$0xff] }
  0x4f   :  { %1276 = vmatpush3.bf16.msra.mxu1 %v1275_v16  ;;  %1256 = vmatpush3.bf16.msra.mxu0 %v1255_v42  ;;  %v344_v52 = vadd.f32 %v343_v54, %v342_v21  ;;  %v231_v16 = vadd.f32 %v230_v17, %v229_v28  ;;  %v360_v19 = vrot.slane %v359_v55, 2  ;;  %v379_v20 = vadd.f32 %v378_v27, %v122_v35  ;;  %v111_v42 = vld [vmem:[%s2514_s0 + $0x300] sm:$0xff]  ;;  %v121_v5 = vld [vmem:[%s2514_s0 + $0x350] sm:$0xff]  ;;  %v543_v28 = vld [vmem:[%s2515_s1 + $0x3f8] sm:$0xff] }
  0x50   :  { %1278 = vmatprep.subr.bf16.mxu1 %v1277_v18  ;;  %1258 = vmatprep.subr.bf16.mxu0 %v1257_v22  ;;  %v235_v39 = vadd.f32 %v234_v33, %v41_v57  ;;  %v216_v12 = vadd.f32 %v215_v51, %v214_v30  ;;  %v251_v46 = vadd.f32 %v250_v14, %v72_v56  ;;  %v542_v9 = vld [vmem:[%s2515_s1 + $0x3f0] sm:$0xff]  ;;  %v71_v49 = vld [vmem:[%s2514_s0 + $0x1c0] sm:$0xff]  ;;  %v527_v57 = vld [vmem:[%s2515_s1 + $0x378] sm:$0xff] }
  0x51   :  { %v345_v43 = vrot.slane %v344_v52, 4  ;;  %v364_v45 = vadd.f32 %v101_v40, %v91_v38  ;;  %v232_v18 = vrot.slane %v231_v16, 1  ;;  %v361_v22 = vadd.f32 %v360_v19, %v359_v55  ;;  %v151_v60 = vld [vmem:[%s2514_s0 + $0x440] sm:$0x1]  ;;  %v141_v62 = vld [vmem:[%s2514_s0 + $0x3f0] sm:$0xff]  ;;  %v545_v27 = vld [vmem:[%s2515_s1 + $0x408] sm:$0xff] }
  0x52   :  { %v380_v54 = vadd.f32 %v379_v20, %v132_v31  ;;  %v236_v6 = vadd.f32 %v235_v39, %v51_v15  ;;  %v217_v29 = vrot.slane %v216_v12, 2  ;;  %v253_v2 = vadd.f32 %v252_v59, %v251_v46  ;;  %v526_v13 = vld [vmem:[%s2515_s1 + $0x370] sm:$0xff] }
  0x53   :  { %1280 = vmatpush3.bf16.msra.mxu1 %v1279_v32  ;;  %1260 = vmatpush3.bf16.msra.mxu0 %v1259_v26  ;;  %v346_v58 = vadd.f32 %v345_v43, %v344_v52  ;;  %v365_v50 = vadd.f32 %v364_v45, %v111_v42  ;;  %v233_v32 = vadd.f32 %v232_v18, %v231_v16  ;;  %v362_v0 = vrot.slane %v361_v22, 1  ;;  %v131_v26 = vld [vmem:[%s2514_s0 + $0x3a0] sm:$0xff]  ;;  %v562_v24 = vld [vmem:[%s2515_s1 + $0x490] sm:$0xff] }
  0x54   :  { %1282 = vmatprep.subr.bf16.mxu1 %v1281_v48  ;;  %1294 = vmatprep.subr.bf16.mxu0 %v1293_v25  ;;  %v381_v3 = vadd.f32 %v380_v54, %v142_v63  ;;  %v237_v59 = vadd.f32 %v236_v6, %v61_v44  ;;  %v218_v47 = vadd.f32 %v217_v29, %v216_v12  ;;  %v254_v21 = vrot.slane %v253_v2, 4  ;;  %v546_v43 = vld [vmem:[%s2515_s1 + $0x410] sm:$0xff]  ;;  %v547_v63 = vld [vmem:[%s2515_s1 + $0x418] sm:$0xff]  ;;  %v565_v44 = vld [vmem:[%s2515_s1 + $0x4a8] sm:$0xff] }
  0x55   :  { %v347_v30 = vrot.slane %v346_v58, 2  ;;  %v366_v61 = vadd.f32 %v365_v50, %v121_v5  ;;  %v1289_v48 = vpack.c.bf16 %v543_v28, %v542_v9  ;;  %v363_v35 = vadd.f32 %v362_v0, %v361_v22  ;;  %v2329_v22 = vld [vmem:[%s2515_s1 + $0x420] sm:$0xff]  ;;  %v2334_v54 = vld [vmem:[%s2515_s1 + $0x428] sm:$0xff]  ;;  %v34_v6 = vld [vmem:[%s2514_s0 + $0x98] sm:$0xff] }
  0x56   :  { %v383_v36 = vadd.f32 %v382_v8, %v381_v3  ;;  %v238_v7 = vadd.f32 %v237_v59, %v71_v49  ;;  %v2518_v25 = vpack.c.bf16 %v1985_v10, %v1967_v4  ;;  %v219_v17 = vrot.slane %v218_v47, 1  ;;  %v544_v10 = vld [vmem:[%s2515_s1 + $0x400] sm:$0xff]  ;;  %v24_v5 = vld [vmem:[%s2514_s0 + $0x48] sm:$0xff]  ;;  %v2345_v29 = vld [vmem:[%s2515_s1 + $0x4b0] sm:$0xff] }
  0x57   :  { %v348_v55 = vadd.f32 %v347_v30, %v346_v58  ;;  %v255_v8 = vadd.f32 %v254_v21, %v253_v2  ;;  %v367_v56 = vadd.f32 %v366_v61, %v131_v26  ;;  %v609_v31 = vsel %vm603_vm1, %v363_v35, %v233_v32  ;;  %v94_v58 = vld [vmem:[%s2514_s0 + $0x278] sm:$0xff]  ;;  %v104_v2 = vld [vmem:[%s2514_s0 + $0x2c8] sm:$0xff]  ;;  %v23_v26 = vld [vmem:[%s2514_s0 + $0x40] sm:$0xff] }
  0x58   :  { %1284 = vmatpush3.bf16.msra.mxu1 %v2518_v25  ;;  %v384_v4 = vrot.slane %v383_v36, 4  ;;  %v240_v1 = vadd.f32 %v239_v41, %v238_v7  ;;  %v369_v33 = vsel %vm160_vm0, %v151_v60, 0.0  ;;  %828 = vmatprep.mubr.f32.mxu0 %v609_v31  ;;  %v220_v51 = vadd.f32 %v219_v17, %v218_v47  ;;  %v44_v3 = vld [vmem:[%s2514_s0 + $0xe8] sm:$0xff]  ;;  %v33_v59 = vld [vmem:[%s2514_s0 + $0x90] sm:$0xff]  ;;  %v567_v30 = vld [vmem:[%s2515_s1 + $0x4b8] sm:$0xff] }
  0x59   :  { %1286 = vmatprep.subr.bf16.mxu1 %v1285_v11  ;;  %v349_v52 = vrot.slane %v348_v55, 1  ;;  %v256_v14 = vrot.slane %v255_v8, 2  ;;  %v368_v23 = vadd.f32 %v367_v56, %v141_v62  ;;  %v563_v11 = vld [vmem:[%s2515_s1 + $0x498] sm:$0xff]  ;;  %v1291_v15 = vpack.c.bf16 %v527_v57, %v526_v13  ;;  %v93_v61 = vld [vmem:[%s2514_s0 + $0x270] sm:$0xff]  ;;  %v43_v13 = vld [vmem:[%s2514_s0 + $0xe0] sm:$0xff] }
  0x5a   :  { %v385_v38 = vadd.f32 %v384_v4, %v383_v36  ;;  %v241_v40 = vrot.slane %v240_v1, 4  ;;  %v1295_v19 = vpack.c.bf16 %v545_v27, %v544_v10  ;;  %v1297_v12 = vpack.c.bf16 %v563_v11, %v562_v24  ;;  %v114_v21 = vld [vmem:[%s2514_s0 + $0x318] sm:$0xff]  ;;  %v2374_v36 = vld [vmem:[%s2515_s1 + $0x430] sm:$0xff]  ;;  %v103_v57 = vld [vmem:[%s2514_s0 + $0x2c0] sm:$0xff] }
  0x5b   :  { %v350_v41 = vadd.f32 %v349_v52, %v348_v55  ;;  %v257_v16 = vadd.f32 %v256_v14, %v255_v8  ;;  %v370_v20 = vadd.f32 %v369_v33, %v368_v23  ;;  %v1299_v28 = vpack.c.bf16 %v547_v63, %v546_v43  ;;  %v2379_v62 = vld [vmem:[%s2515_s1 + $0x438] sm:$0xff]  ;;  %v568_v8 = vld [vmem:[%s2515_s1 + $0x4c0] sm:$0xff]  ;;  %v569_v56 = vld [vmem:[%s2515_s1 + $0x4c8] sm:$0xff] }
  0x5c   :  { %1288 = vmatpush3.bf16.msra.mxu1 %v1287_v53  ;;  %v386_v42 = vrot.slane %v385_v38, 2  ;;  %v242_v39 = vadd.f32 %v241_v40, %v240_v1  ;;  %v564_v53 = vld [vmem:[%s2515_s1 + $0x4a0] sm:$0xff]  ;;  %v273_v60 = vadd.f32 %v34_v6, %v24_v5  ;;  %v54_v7 = vld [vmem:[%s2514_s0 + $0x138] sm:$0xff]  ;;  %v403_v25 = vadd.f32 %v104_v2, %v94_v58  ;;  %v124_v31 = vld [vmem:[%s2514_s0 + $0x368] sm:$0xff] }
  0x5d   :  { %1290 = vmatprep.subr.bf16.mxu1 %v1289_v48  ;;  %v608_v46 = vsel %vm603_vm1, %v350_v41, %v220_v51  ;;  %v258_v34 = vrot.slane %v257_v16, 1  ;;  %v371_v37 = vrot.slane %v370_v20, 4  ;;  %v1301_v0 = vpack.c.bf16 %v565_v44, %v564_v53  ;;  %v113_v10 = vld [vmem:[%s2514_s0 + $0x310] sm:$0xff]  ;;  %v64_v51 = vld [vmem:[%s2514_s0 + $0x188] sm:$0xff] }
  0x5e   :  { %829 = vmatmul.mubr.f32.vlgmr.msra.gmra.mrb[2].mxu0 %v608_v46  ;;  %v387_v45 = vadd.f32 %v386_v42, %v385_v38  ;;  %v243_v18 = vrot.slane %v242_v39, 2  ;;  %v1303_v55 = vpack.c.bf16 %v2334_v54, %v2329_v22  ;;  %v274_v4 = vadd.f32 %v273_v60, %v44_v3  ;;  %v53_v14 = vld [vmem:[%s2514_s0 + $0x130] sm:$0xff] }
  0x5f   :  { %1296 = vmatpush3.bf16.msra.mxu0 %v1295_v19  ;;  %v372_v9 = vadd.f32 %v371_v37, %v370_v20  ;;  %v259_v49 = vadd.f32 %v258_v34, %v257_v16  ;;  %v260_v27 = vadd.f32 %v33_v59, %v23_v26  ;;  %v1305_v33 = vpack.c.bf16 %v567_v30, %v2345_v29 }
  0x60   :  { %1292 = vmatpush3.bf16.msra.mxu1 %v1291_v15  ;;  %v388_v50 = vrot.slane %v387_v45, 1  ;;  %v244_v32 = vadd.f32 %v243_v18, %v242_v39  ;;  %1298 = vmatprep.subr.bf16.mxu0 %v1297_v12  ;;  %v404_v52 = vadd.f32 %v403_v25, %v114_v21  ;;  %v390_v23 = vadd.f32 %v103_v57, %v93_v61 }
  0x61   :  { %v373_v47 = vrot.slane %v372_v9, 2 }
  0x62   :  { %v389_v48 = vadd.f32 %v388_v50, %v387_v45  ;;  %v245_v35 = vrot.slane %v244_v32, 1 }
  0x63   :  { %v374_v17 = vadd.f32 %v373_v47, %v372_v9  ;;  %1300 = vmatpush3.bf16.msra.mxu0 %v1299_v28 }
  0x64   :  { %v611_v1 = vsel %vm603_vm1, %v389_v48, %v259_v49  ;;  %1302 = vmatprep.subr.bf16.mxu0 %v1301_v0 }
  0x65   :  { %8 = vsyncpa [#allocation3], 0  ;;  %898 = vmatprep.mubr.f32.mxu1 %v611_v1  ;;  %v246_v24 = vadd.f32 %v245_v35, %v244_v32  ;;  %v375_v11 = vrot.slane %v374_v17, 1  ;;  %v84_v15 = vld [vmem:[%s2514_s0 + $0x228] sm:$0x1]  ;;  %v134_v38 = vld [vmem:[%s2514_s0 + $0x3b8] sm:$0xff]  ;;  %v275_v40 = vadd.f32 %v274_v4, %v54_v7  ;;  %v261_v16 = vadd.f32 %v260_v27, %v43_v13 }
  0x66   :  { %v123_v41 = vld [vmem:[%s2514_s0 + $0x360] sm:$0xff]  ;;  %v74_v20 = vld [vmem:[%s2514_s0 + $0x1d8] sm:$0xff]  ;;  %v405_v39 = vadd.f32 %v404_v52, %v124_v31  ;;  %v391_v43 = vadd.f32 %v390_v23, %v113_v10  ;;  %v1307_v46 = vpack.c.bf16 %v2379_v62, %v2374_v36  ;;  %v144_v34 = vld [vmem:[%s2514_s0 + $0x408] sm:$0xff]  ;;  %v1309_v18 = vpack.c.bf16 %v569_v56, %v568_v8  ;;  %s1350_s18 = smov [#allocation2]  }
  0x67   :  { %v552_v19 = vld [vmem:[%s2515_s1 + $0x440] sm:$0xff]  ;;  %v154_v42 = vld [vmem:[%s2514_s0 + $0x458] sm:$0x1]  ;;  %v376_v63 = vadd.f32 %v375_v11, %v374_v17  ;;  %1304 = vmatpush3.bf16.msra.mxu0 %v1303_v55  ;;  %v276_v37 = vadd.f32 %v275_v40, %v64_v51  ;;  %v133_v44 = vld [vmem:[%s2514_s0 + $0x3b0] sm:$0xff]  ;;  %v262_v45 = vadd.f32 %v261_v16, %v53_v14  ;;  %v278_v54 = vsel %vm160_vm0, %v84_v15, 0.0  ;;  %s981_s19 = sshll.u32 %s1350_s18, 4  ;;  %s982_s19 = int_to_ptr.vmem [resolvable:$true] %s981_s19 }
  0x68   :  { %v63_v12 = vld [vmem:[%s2514_s0 + $0x180] sm:$0xff]  ;;  %1306 = vmatprep.subr.bf16.mxu0 %v1305_v33  ;;  %v553_v22 = vld [vmem:[%s2515_s1 + $0x448] sm:$0xff]  ;;  %v406_v5 = vadd.f32 %v405_v39, %v134_v38  ;;  %v73_v6 = vld [vmem:[%s2514_s0 + $0x1d0] sm:$0xff]  ;;  %v392_v28 = vadd.f32 %v391_v43, %v123_v41  ;;  %v408_v50 = vsel %vm160_vm0, %v154_v42, 0.0  ;;  %p1331_p1 = scmp.lt.s32.totalorder %s982_s19, %s982_s19 }
  0x69   :  { %v83_v53 = vld [vmem:[%s2514_s0 + $0x220] sm:$0x1]  ;;  %v153_v9 = vld [vmem:[%s2514_s0 + $0x450] sm:$0x1]  ;;  %v610_v29 = vsel %vm603_vm1, %v376_v63, %v246_v24  ;;  %v571_v2 = vld [vmem:[%s2515_s1 + $0x4d8] sm:$0xff]  ;;  %v277_v49 = vadd.f32 %v276_v37, %v74_v20  ;;  %v263_v0 = vadd.f32 %v262_v45, %v63_v12  ;;  %v1311_v47 = vpack.c.bf16 %v553_v22, %v552_v19 }
  0x6a   :  { %v570_v58 = vld [vmem:[%s2515_s1 + $0x4d0] sm:$0xff]  ;;  %v143_v32 = vld [vmem:[%s2514_s0 + $0x400] sm:$0xff]  ;;  %899 = vmatmul.mubr.f32.vlgmr.msra.gmra.mrb[2].mxu1 %v610_v29  ;;  %v407_v3 = vadd.f32 %v406_v5, %v144_v34  ;;  %v265_v26 = vsel %vm160_vm0, %v83_v53, 0.0  ;;  %v393_v59 = vadd.f32 %v392_v28, %v133_v44  ;;  %v395_v60 = vsel %vm160_vm0, %v153_v9, 0.0  ;;  %v555_v35 = vld [vmem:[%s2515_s1 + $0x458] sm:$0xff] }
  0x6b   :  { %1308 = vmatpush3.bf16.msra.mxu0 %v1307_v46  ;;  %v279_v30 = vadd.f32 %v278_v54, %v277_v49  ;;  %v264_v21 = vadd.f32 %v263_v0, %v73_v6  ;;  %v1313_v61 = vpack.c.bf16 %v571_v2, %v570_v58  ;;  %v554_v48 = vld [vmem:[%s2515_s1 + $0x450] sm:$0xff]  ;;  %v572_v7 = vld [vmem:[%s2515_s1 + $0x4e0] sm:$0xff]  ;;  %v573_v25 = vld [vmem:[%s2515_s1 + $0x4e8] sm:$0xff] }
  0x6c   :  { %1310 = vmatprep.subr.bf16.mxu0 %v1309_v18  ;;  %v409_v36 = vadd.f32 %v408_v50, %v407_v3  ;;  %v394_v62 = vadd.f32 %v393_v59, %v143_v32  ;;  %v1315_v8 = vpack.c.bf16 %v555_v35, %v554_v48  ;;  %v1317_v4 = vpack.c.bf16 %v573_v25, %v572_v7  ;;  %v556_v10 = vld [vmem:[%s2515_s1 + $0x460] sm:$0xff]  ;;  %v557_v27 = vld [vmem:[%s2515_s1 + $0x468] sm:$0xff]  ;;  %v574_v51 = vld [vmem:[%s2515_s1 + $0x4f0] sm:$0xff] }
  0x6d   :  { %v280_v13 = vrot.slane %v279_v30, 4  ;;  %v266_v57 = vadd.f32 %v265_v26, %v264_v21  ;;  %v575_v52 = vld [vmem:[%s2515_s1 + $0x4f8] sm:$0xff]  ;;  %v1319_v15 = vpack.c.bf16 %v557_v27, %v556_v10  ;;  %v558_v16 = vld [vmem:[%s2515_s1 + $0x470] sm:$0xff]  ;;  %v989_v28 = vld [vmem:[%s2516_s2] ss:$0 sm:$0xff]  ;;  %s1326_s2 = scalar_lea.vmem %s982_s19, 32 }
  0x6e   :  { %v410_v17 = vrot.slane %v409_v36, 4  ;;  %v396_v55 = vadd.f32 %v395_v60, %v394_v62  ;;  %v1321_v41 = vpack.c.bf16 %v575_v52, %v574_v51  ;;  %v559_v19 = vld [vmem:[%s2515_s1 + $0x478] sm:$0xff]  ;;  %p1327_p0 = scmp.ne.s32.totalorder %s982_s19, %s1326_s2  ;;  %p1332_p2 = scmp.lt.s32.totalorder %s1326_s2, %s1326_s2 }
  0x6f   :  { %1312 = vmatpush3.bf16.msra.mxu0 %v1311_v47  ;;  %v281_v56 = vadd.f32 %v280_v13, %v279_v30  ;;  %v267_v31 = vrot.slane %v266_v57, 4  ;;  %v1323_v46 = vpack.c.bf16 %v559_v19, %v558_v16 }
  0x70   :  { %1314 = vmatprep.subr.bf16.mxu0 %v1313_v61  ;;  %v411_v1 = vadd.f32 %v410_v17, %v409_v36  ;;  %v397_v33 = vrot.slane %v396_v55, 4  ;;  %p1333_p3 = por %p1332_p2, %p1331_p1 }
  0x71   :  { %v282_v14 = vrot.slane %v281_v56, 2  ;;  %v268_v23 = vadd.f32 %v267_v31, %v266_v57 }
  0x72   :  { %v412_v24 = vrot.slane %v411_v1, 2  ;;  %v398_v11 = vadd.f32 %v397_v33, %v396_v55  ;;  %p1334_p4 = pnand %p1333_p3, %p1327_p0 }
  0x73   :  { %1316 = vmatpush3.bf16.msra.mxu0 %v1315_v8  ;;  %v283_v38 = vadd.f32 %v282_v14, %v281_v56  ;;  %v269_v40 = vrot.slane %v268_v23, 2 }
  0x74   :  { %1318 = vmatprep.subr.bf16.mxu0 %v1317_v4  ;;  %v413_v20 = vadd.f32 %v412_v24, %v411_v1  ;;  %v399_v42 = vrot.slane %v398_v11, 2 }
  0x75   :  { %v284_v39 = vrot.slane %v283_v38, 1  ;;  %v270_v12 = vadd.f32 %v269_v40, %v268_v23 }
  0x76   :  { %v414_v43 = vrot.slane %v413_v20, 1  ;;  %v400_v63 = vadd.f32 %v399_v42, %v398_v11 }
  0x77   :  { %1320 = vmatpush3.bf16.msra.mxu0 %v1319_v15  ;;  %v285_v34 = vadd.f32 %v284_v39, %v283_v38  ;;  %v271_v37 = vrot.slane %v270_v12, 1 }
  0x78   :  { %1322 = vmatprep.subr.bf16.mxu0 %v1321_v41  ;;  %v415_v53 = vadd.f32 %v414_v43, %v413_v20  ;;  %v401_v44 = vrot.slane %v400_v63, 1 }
  0x79   :  { %v272_v45 = vadd.f32 %v271_v37, %v270_v12 }
  0x7a   :  { %v613_v18 = vsel %vm603_vm1, %v415_v53, %v285_v34  ;;  %v402_v22 = vadd.f32 %v401_v44, %v400_v63 }
  0x7b   :  { %1324 = vmatpush3.bf16.msra.mxu0 %v1323_v46  ;;  %968 = vmatprep.mubr.f32.mxu0 %v613_v18 }
  0x7c   :  { %v612_v54 = vsel %vm603_vm1, %v402_v22, %v272_v45 }
  0x7e   :  { %969 = vmatmul.mubr.f32.vlgmr.msra.gmra.mrb[4].mxu0 %v612_v54 }
 0x109   :  { %v1022_v5 = vpop.f32.mrb[0].mxu0 }
 0x10a   :  { %v1023_v6 = vpop.f32.mrb[1].mxu0 }
 0x10b   :  { %v1024_v9 = vadd.f32 %v1023_v6, %v1022_v5 }
 0x10d   :  { %v691_v29 = vadd.f32 %v1024_v9, %v989_v28 }
 0x115   :  { %v1057_v58 = vpop.f32.mrb[0].mxu1 }
 0x116   :  { %v1058_v2 = vpop.f32.mrb[1].mxu1 }
 0x117   :  { %v1059_v49 = vadd.f32 %v1058_v2, %v1057_v58 }
 0x119   :  { %v761_v50 = vadd.f32 %v1059_v49, %v691_v29 }
 0x131   :  { %v1092_v32 = vpop.f32.mrb[2].mxu0 }
 0x132   :  { %v1093_v0 = vpop.f32.mrb[3].mxu0 }
 0x133   :  { %v1094_v3 = vadd.f32 %v1093_v0, %v1092_v32 }
 0x135   :  { %v831_v26 = vadd.f32 %v1094_v3, %v761_v50 }
 0x13d   :  { %v1127_v59 = vpop.f32.mrb[2].mxu1 }
 0x13e   :  { %v1128_v47 = vpop.f32.mrb[3].mxu1 }
 0x13f   :  { %v1129_v30 = vadd.f32 %v1128_v47, %v1127_v59 }
 0x141   :  { %v901_v21 = vadd.f32 %v1129_v30, %v831_v26 }
 0x151   :  { %v1162_v60 = vpop.f32.mrb[4].mxu0 }
 0x152   :  { %v1163_v61 = vpop.f32.mrb[5].mxu0 }
 0x153   :  { %v1164_v48 = vadd.f32 %v1163_v61, %v1162_v60 }
 0x155   :  { %v971_v35 = vadd.f32 %v1164_v48, %v901_v21 }
 0x157   :  { %974 = vst [vmem:[#allocation2] sm:$0x3] %v971_v35 }
 0x158   :  { %1337 = shalt.err (!%p1334_p4)
}
 0x159   :  { %s1338_s22 = scalar_lea.hbm %s2517_s3, 32 }
 0x15a   :  { %p1339_p5 = scmp.ne.s32.totalorder %s2517_s3, %s1338_s22  ;;  %p1342_p6 = scmp.lt.u32.totalorder %s1338_s22, %s2517_s3 }
 0x15c   :  { %p1344_p7 = pnand %p1342_p6, %p1339_p5 }
 0x15e   :  { %1347 = shalt.err (!%p1344_p7)
}
 0x15f   :  { %984 = dma.vmem_to_hbm [thread:$0]  %s982_s19, 32, %s2517_s3, [#allocation3]  }
 0x160   :  { %1348 = dma.done.wait [#allocation3], 32  }
 0x161   :  { %1349 = vsyncadd [#allocation3], 4294967264 }
 0x162   :  { %988 = vsyncpa [#allocation3], 1 }

</bundles_post_ra>
